<compile_context>
chip_gen: v7x
topology: tpu7x:2x2x1
jax: 0.10.0
libtpu: 0.0.40
codegen_flags: <defaults>
</compile_context>

<pallas_src>
import jax
import jax.numpy as jnp
from jax.experimental import pallas as pl
from jax.experimental.pallas import tpu as pltpu


# ----------------------------- fused Pallas kernel ------------------------------ #

def fused_vqa_kernel(cols_ref, q_ref, w_conv_ref, b_conv_ref, w_emb_ref, b_emb_ref,
                     w_fc_ref, b_out_ref, o_ref):
    """Whole SimpleBaselineNet forward in one VMEM-resident invocation.

    cols_ref : (B*HW, K_PAD)            bf16  im2col patches, all images flattened
    q_ref    : (B, S, V)                bf16  one-hot question encodings
    w_conv   : (K_PAD, C_MID)           bf16
    b_conv   : (1, C_MID)               f32
    w_emb    : (V, EMB_PAD)             bf16
    b_emb    : (1, EMB_PAD)             f32
    w_fc     : (C_MID+EMB_PAD, N_PAD)   bf16  [w_img @ w_fc_img ; w_fc_word] stacked
    b_out    : (1, N_PAD)               f32   b_img @ w_fc_img + b_fc
    o_ref    : (B, N_PAD)               f32
    """
    B = q_ref.shape[0]
    hw = cols_ref.shape[0] // B
    c_mid = w_conv_ref.shape[1]

    # ---- image path: conv-as-matmul (M = B*HW) + ReLU + per-image global avg pool
    conv = jnp.dot(cols_ref[...], w_conv_ref[...],
                   preferred_element_type=jnp.float32)                 # (B*HW, C_MID)
    conv = jnp.maximum(conv + b_conv_ref[...], 0.0)
    pooled = jnp.mean(conv.reshape(B, hw, c_mid), axis=1)              # (B, C_MID)

    # ---- word path: BOW (clamp(sum,0,1)) fused with the embedding matmul
    bow = jnp.clip(jnp.sum(q_ref[...].astype(jnp.float32), axis=1), 0.0, 1.0)   # (B, V)
    word = jnp.dot(bow.astype(w_emb_ref.dtype), w_emb_ref[...],
                   preferred_element_type=jnp.float32) + b_emb_ref[...]         # (B, EMB_PAD)

    # ---- classifier: single MXU op over the concatenated K; image FC folded in
    feats = jnp.concatenate([pooled.astype(w_fc_ref.dtype),
                             word.astype(w_fc_ref.dtype)], axis=-1)    # (B, C_MID+EMB_PAD)
    logits = jnp.dot(feats, w_fc_ref[...],
                     preferred_element_type=jnp.float32) + b_out_ref[...]
    o_ref[...] = logits.astype(o_ref.dtype)


# ------------------------------ wrapper ----------------------------------- #

def pallas_vqa_forward(cols_flat, q_enc, kp):
    B = q_enc.shape[0]
    m, k_pad = cols_flat.shape
    c_mid = kp["w_conv"].shape[1]
    vocab, emb_pad = kp["w_emb"].shape
    n_pad = kp["w_fc_cat"].shape[1]

    flops = (2 * m * k_pad * c_mid                  # conv-as-matmul
             + 2 * B * vocab * emb_pad              # BOW embedding
             + 2 * B * (c_mid + emb_pad) * n_pad)   # folded classifier
    bytes_accessed = int(cols_flat.size * cols_flat.dtype.itemsize
                         + q_enc.size * q_enc.dtype.itemsize
                         + sum(v.size * v.dtype.itemsize for v in kp.values())
                         + B * n_pad * 4)

    vmem = pl.BlockSpec(memory_space=pltpu.MemorySpace.VMEM)
    return pl.pallas_call(
        fused_vqa_kernel,
        out_shape=jax.ShapeDtypeStruct((B, n_pad), jnp.float32),
        in_specs=[vmem] * 8,
        out_specs=vmem,
        cost_estimate=pl.CostEstimate(flops=flops, transcendentals=0,
                                      bytes_accessed=bytes_accessed),
    )(cols_flat, q_enc, kp["w_conv"], kp["b_conv"], kp["w_emb"], kp["b_emb"],
      kp["w_fc_cat"], kp["b_out"])


# ------------------------------- model glue -------------------------------- #

def im2col_3x3(x_nhwc, k_pad):
    """3x3, stride 1, pad 1 patch extraction -> (B, H*W, k_pad) (zero-padded K)."""
    B, H, W, C = x_nhwc.shape
    xp = jnp.pad(x_nhwc, ((0, 0), (1, 1), (1, 1), (0, 0)))
    patches = [xp[:, dy:dy + H, dx:dx + W, :] for dy in range(3) for dx in range(3)]
    cols = jnp.stack(patches, axis=3).reshape(B, H * W, 9 * C)
    if k_pad > 9 * C:
        cols = jnp.pad(cols, ((0, 0), (0, 0), (0, k_pad - 9 * C)))
    return cols


def simple_baseline_net(kernel_params, image_nchw, question_encoding, num_answers):
    """Forward. image_nchw: (B,C,H,W) f32; question_encoding: (B,S,V) one-hot f32."""
    B = image_nchw.shape[0]
    x = jnp.transpose(image_nchw, (0, 2, 3, 1))                       # NCHW -> NHWC
    cols = im2col_3x3(x, kernel_params["w_conv"].shape[0])            # (B, HW, K_PAD)
    cols_flat = cols.reshape(B * cols.shape[1], cols.shape[2]).astype(jnp.bfloat16)
    q_bf16 = question_encoding.astype(jnp.bfloat16)                   # one-hots exact in bf16
    logits = pallas_vqa_forward(cols_flat, q_bf16, kernel_params)     # (B, N_PAD)
    return logits[:, :num_answers]


def _pad2d(a, rows, cols):
    return jnp.pad(a, ((0, rows - a.shape[0]), (0, cols - a.shape[1])))


def init_params(key, c_in, c_mid, vocab, emb, emb_pad, n_ans, n_ans_pad, k_pad):
    ks = jax.random.split(key, 8)
    s = 0.05
    w_conv = s * jax.random.normal(ks[0], (9 * c_in, c_mid), jnp.float32)
    b_conv = s * jax.random.normal(ks[1], (1, c_mid), jnp.float32)
    w_img = s * jax.random.normal(ks[2], (c_mid, emb), jnp.float32)
    b_img = s * jax.random.normal(ks[3], (1, emb), jnp.float32)
    w_emb = s * jax.random.normal(ks[4], (vocab, emb), jnp.float32)
    b_emb = s * jax.random.normal(ks[5], (1, emb), jnp.float32)
    w_fc = s * jax.random.normal(ks[6], (2 * emb, n_ans), jnp.float32)
    b_fc = s * jax.random.normal(ks[7], (1, n_ans), jnp.float32)

    # module-structured (reference) weights, lane-dense padded, bf16 weight streaming
    ref = {
        "w_conv": _pad2d(w_conv, k_pad, c_mid).astype(jnp.bfloat16),
        "b_conv": b_conv,
        "w_img": _pad2d(w_img, c_mid, emb_pad).astype(jnp.bfloat16),
        "b_img": _pad2d(b_img, 1, emb_pad),
        "w_emb": _pad2d(w_emb, vocab, emb_pad).astype(jnp.bfloat16),
        "b_emb": _pad2d(b_emb, 1, emb_pad),
        "w_fc_img": _pad2d(w_fc[:emb], emb_pad, n_ans_pad).astype(jnp.bfloat16),
        "w_fc_word": _pad2d(w_fc[emb:], emb_pad, n_ans_pad).astype(jnp.bfloat16),
        "b_fc": _pad2d(b_fc, 1, n_ans_pad),
    }

    # kernel-side weights: image FC folded into the classifier, halves pre-stacked
    w_if = ref["w_img"].astype(jnp.float32) @ ref["w_fc_img"].astype(jnp.float32)   # (C_MID, N_PAD)
    b_out = ref["b_img"] @ ref["w_fc_img"].astype(jnp.float32) + ref["b_fc"]        # (1, N_PAD)
    kern = {
        "w_conv": ref["w_conv"],
        "b_conv": ref["b_conv"],
        "w_emb": ref["w_emb"],
        "b_emb": ref["b_emb"],
        "w_fc_cat": jnp.concatenate([w_if.astype(jnp.bfloat16), ref["w_fc_word"]],
                                    axis=0),                                        # (C_MID+EMB_PAD, N_PAD)
        "b_out": b_out,
    }
    return ref, kern


def reference_forward(ref_params, image_nchw, question_encoding, num_answers, k_pad):
    """Pure-JAX reference mirroring the PyTorch module (f32 math, bf16-quantized weights)."""
    x = jnp.transpose(image_nchw, (0, 2, 3, 1))
    cols = im2col_3x3(x, k_pad)
    conv = jnp.maximum(
        jnp.einsum("bmk,kc->bmc", cols, ref_params["w_conv"].astype(jnp.float32))
        + ref_params["b_conv"], 0.0)
    pooled = jnp.mean(conv, axis=1)
    img = pooled @ ref_params["w_img"].astype(jnp.float32) + ref_params["b_img"]
    bow = jnp.clip(jnp.sum(question_encoding, axis=1), 0.0, 1.0)
    word = bow @ ref_params["w_emb"].astype(jnp.float32) + ref_params["b_emb"]
    logits = (img @ ref_params["w_fc_img"].astype(jnp.float32)
              + word @ ref_params["w_fc_word"].astype(jnp.float32)
              + ref_params["b_fc"])
    return logits[:, :num_answers]


# --------------------------------- main ------------------------------------ #

if __name__ == "__main__":
    B = 2            # batch
    C_IN = 3         # image channels
    HW = 16          # spatial side (H = W = 16 -> 256 positions)
    C_MID = 128      # stand-in conv channels (lane-dense)
    SEQ = 8          # question length
    VOCAB = 32       # question_word_list_length
    EMB = 1000       # word / image feature dim (fixed by the module)
    EMB_PAD = 1024   # lane-dense padding of EMB
    N_ANS = 10       # num_possible_answers
    N_ANS_PAD = 128  # lane-dense padding of the classifier output
    K_PAD = 32       # padded 9*C_IN (=27) for aligned MXU K

    key = jax.random.PRNGKey(0)
    k_param, k_img, k_q = jax.random.split(key, 3)

    ref_params, kern_params = init_params(k_param, C_IN, C_MID, VOCAB, EMB, EMB_PAD,
                                          N_ANS, N_ANS_PAD, K_PAD)

    image = jax.random.normal(k_img, (B, C_IN, HW, HW), jnp.float32)
    word_ids = jax.random.randint(k_q, (B, SEQ), 0, VOCAB)
    question_encoding = jax.nn.one_hot(word_ids, VOCAB, dtype=jnp.float32)

    fwd = jax.jit(simple_baseline_net, static_argnums=3)
    logits = fwd(kern_params, image, question_encoding, N_ANS)
    jax.block_until_ready(logits)

    assert logits.shape == (B, N_ANS), logits.shape
    assert logits.dtype == jnp.float32

    ref = reference_forward(ref_params, image, question_encoding, N_ANS, K_PAD)
    max_err = float(jnp.max(jnp.abs(logits - ref)))
    assert bool(jnp.allclose(logits, ref, atol=5e-2, rtol=5e-2)), max_err

    print("KERNEL_OK")
</pallas_src>

<mosaic_0001>
module attributes {stable_mosaic.version = 11 : i64} {
  func.func @fused_vqa_kernel(%arg0: memref<512x32xbf16, #tpu.memory_space<vmem>>, %arg1: memref<2x8x32xbf16, #tpu.memory_space<vmem>>, %arg2: memref<32x128xbf16, #tpu.memory_space<vmem>>, %arg3: memref<1x128xf32, #tpu.memory_space<vmem>>, %arg4: memref<32x1024xbf16, #tpu.memory_space<vmem>>, %arg5: memref<1x1024xf32, #tpu.memory_space<vmem>>, %arg6: memref<1152x128xbf16, #tpu.memory_space<vmem>>, %arg7: memref<1x128xf32, #tpu.memory_space<vmem>>, %arg8: memref<2x128xf32, #tpu.memory_space<vmem>>) attributes {dimension_semantics = [], scalar_prefetch = 0 : i64, scratch_operands = 0 : i64, tpu.core_type = #tpu.core_type<tc>} {
    %c0 = arith.constant 0 : index
    %c0_0 = arith.constant 0 : index
    %0 = vector.load %arg0[%c0, %c0_0] : memref<512x32xbf16, #tpu.memory_space<vmem>>, vector<512x32xbf16>
    %c0_1 = arith.constant 0 : index
    %c0_2 = arith.constant 0 : index
    %1 = vector.load %arg2[%c0_1, %c0_2] : memref<32x128xbf16, #tpu.memory_space<vmem>>, vector<32x128xbf16>
    %cst = arith.constant dense<0.000000e+00> : vector<512x128xf32>
    %2 = tpu.matmul %0, %1, %cst {dimension_numbers = #tpu.dot_dimension_numbers<[1], [0], [0], [1], [0, 0, 1, 1], [], []>} : vector<512x32xbf16>, vector<32x128xbf16>, vector<512x128xf32> -> vector<512x128xf32>
    %c0_3 = arith.constant 0 : index
    %c0_4 = arith.constant 0 : index
    %3 = vector.load %arg3[%c0_3, %c0_4] : memref<1x128xf32, #tpu.memory_space<vmem>>, vector<1x128xf32>
    %4 = vector.broadcast %3 : vector<1x128xf32> to vector<512x128xf32>
    %5 = arith.addf %2, %4 : vector<512x128xf32>
    %cst_5 = arith.constant 0.000000e+00 : f32
    %6 = vector.broadcast %cst_5 : f32 to vector<512x128xf32>
    %7 = arith.maximumf %5, %6 : vector<512x128xf32>
    %8 = vector.shape_cast %7 : vector<512x128xf32> to vector<2x256x128xf32>
    %cst_6 = arith.constant dense<0.000000e+00> : vector<2x128xf32>
    %9 = vector.multi_reduction <add>, %8, %cst_6 [1] : vector<2x256x128xf32> to vector<2x128xf32>
    %cst_7 = arith.constant 2.560000e+02 : f32
    %10 = vector.broadcast %cst_7 : f32 to vector<2x128xf32>
    %11 = arith.divf %9, %10 : vector<2x128xf32>
    %c0_8 = arith.constant 0 : index
    %c0_9 = arith.constant 0 : index
    %c0_10 = arith.constant 0 : index
    %12 = vector.load %arg1[%c0_8, %c0_9, %c0_10] : memref<2x8x32xbf16, #tpu.memory_space<vmem>>, vector<2x8x32xbf16>
    %13 = arith.extf %12 : vector<2x8x32xbf16> to vector<2x8x32xf32>
    %cst_11 = arith.constant dense<0.000000e+00> : vector<2x32xf32>
    %14 = vector.multi_reduction <add>, %13, %cst_11 [1] : vector<2x8x32xf32> to vector<2x32xf32>
    %cst_12 = arith.constant 0.000000e+00 : f32
    %cst_13 = arith.constant 1.000000e+00 : f32
    %15 = vector.broadcast %cst_12 : f32 to vector<2x32xf32>
    %16 = arith.maximumf %15, %14 : vector<2x32xf32>
    %17 = vector.broadcast %cst_13 : f32 to vector<2x32xf32>
    %18 = arith.minimumf %17, %16 : vector<2x32xf32>
    %19 = arith.truncf %18 : vector<2x32xf32> to vector<2x32xbf16>
    %c0_14 = arith.constant 0 : index
    %c0_15 = arith.constant 0 : index
    %20 = vector.load %arg4[%c0_14, %c0_15] : memref<32x1024xbf16, #tpu.memory_space<vmem>>, vector<32x1024xbf16>
    %cst_16 = arith.constant dense<0.000000e+00> : vector<2x1024xf32>
    %21 = tpu.matmul %19, %20, %cst_16 {dimension_numbers = #tpu.dot_dimension_numbers<[1], [0], [0], [1], [0, 0, 1, 1], [], []>} : vector<2x32xbf16>, vector<32x1024xbf16>, vector<2x1024xf32> -> vector<2x1024xf32>
    %c0_17 = arith.constant 0 : index
    %c0_18 = arith.constant 0 : index
    %22 = vector.load %arg5[%c0_17, %c0_18] : memref<1x1024xf32, #tpu.memory_space<vmem>>, vector<1x1024xf32>
    %23 = vector.broadcast %22 : vector<1x1024xf32> to vector<2x1024xf32>
    %24 = arith.addf %21, %23 : vector<2x1024xf32>
    %25 = arith.truncf %11 : vector<2x128xf32> to vector<2x128xbf16>
    %26 = arith.truncf %24 : vector<2x1024xf32> to vector<2x1024xbf16>
    %27 = tpu.concatenate %25, %26 in 1 : vector<2x128xbf16>, vector<2x1024xbf16> -> vector<2x1152xbf16>
    %c0_19 = arith.constant 0 : index
    %c0_20 = arith.constant 0 : index
    %28 = vector.load %arg6[%c0_19, %c0_20] : memref<1152x128xbf16, #tpu.memory_space<vmem>>, vector<1152x128xbf16>
    %cst_21 = arith.constant dense<0.000000e+00> : vector<2x128xf32>
    %29 = tpu.matmul %27, %28, %cst_21 {dimension_numbers = #tpu.dot_dimension_numbers<[1], [0], [0], [1], [0, 0, 1, 1], [], []>} : vector<2x1152xbf16>, vector<1152x128xbf16>, vector<2x128xf32> -> vector<2x128xf32>
    %c0_22 = arith.constant 0 : index
    %c0_23 = arith.constant 0 : index
    %30 = vector.load %arg7[%c0_22, %c0_23] : memref<1x128xf32, #tpu.memory_space<vmem>>, vector<1x128xf32>
    %31 = vector.broadcast %30 : vector<1x128xf32> to vector<2x128xf32>
    %32 = arith.addf %29, %31 : vector<2x128xf32>
    %c0_24 = arith.constant 0 : index
    %c0_25 = arith.constant 0 : index
    %33 = vector.load %arg8[%c0_24, %c0_25] : memref<2x128xf32, #tpu.memory_space<vmem>>, vector<2x128xf32>
    tpu.vector_store %arg8[%c0_24, %c0_25], %32 {strides = array<i32>} : memref<2x128xf32, #tpu.memory_space<vmem>>, vector<2x128xf32>,
    return
  }
}

</mosaic_0001>

<bundles_post_ra>
// kernel: simple_baseline_net.1
= control target key start
LH: loop header
LB: loop body
LE: loop exit
PB: predicated region body
PF: predicated region fallthrough
CT: control target
= control target key end

     0   :  { %vm278_vm0 = vcmask 261120   ;;  %v2473_v3 = vmov 0   ;;  %vm891_vm1 = vcmask 1041409   ;;  %s3061_s0 = inlined_call_operand.vmem [shape: bf16[512,32], index: 0, kind: input, shape index: {}]   ;;  %s3062_s1 = inlined_call_operand.vmem [shape: bf16[2,8,32], index: 1, kind: input, shape index: {}]   ;;  %s3063_s2 = inlined_call_operand.vmem [shape: bf16[32,128], index: 2, kind: input, shape index: {}]   ;;  %s3064_s3 = inlined_call_operand.vmem [shape: f32[1,128], index: 3, kind: input, shape index: {}]   ;;  %s3065_s4 = inlined_call_operand.vmem [shape: bf16[32,1024], index: 4, kind: input, shape index: {}]   ;;  %s3066_s5 = inlined_call_operand.vmem [shape: f32[1,1024], index: 5, kind: input, shape index: {}]   ;;  %s3067_s6 = inlined_call_operand.vmem [shape: bf16[1152,128], index: 6, kind: input, shape index: {}]   ;;  %s3068_s7 = inlined_call_operand.vmem [shape: f32[1,128], index: 7, kind: input, shape index: {}]   ;;  %s3069_s8 = inlined_call_operand.hbm [shape: f32[2,128], index: 8, kind: output, shape index: {}]  }
   0x1   :  { %v2343_v0 = vld [vmem:[%s3063_s2] sm:$0xff]   ;;  %v2344_v1 = vld [vmem:[%s3063_s2 + $0x8] sm:$0xff]   ;;  %1009 = vmatprep.mubr.bf16.mxu1 %v2473_v3  ;;  %v2347_v5 = vld [vmem:[%s3061_s0 + $0x10] sm:$0xff]  }
   0x2   :  { %2251 = vmatprep.subr.bf16.mxu0 %v2343_v0  ;;  %v2345_v2 = vld [vmem:[%s3061_s0] sm:$0xff]   ;;  %v2346_v4 = vld [vmem:[%s3061_s0 + $0x8] sm:$0xff]   ;;  %v2348_v6 = vld [vmem:[%s3061_s0 + $0x18] sm:$0xff]  }
   0x3   :  { %2252 = vmatpush3.bf16.msra.mxu0 %v2343_v0  ;;  %2255 = vmatprep.mubr.msk.bf16.mxu0 %vm278_vm0, %v2345_v2  ;;  %v2349_v7 = vld [vmem:[%s3061_s0 + $0x20] sm:$0xff]   ;;  %v2350_v8 = vld [vmem:[%s3061_s0 + $0x28] sm:$0xff]   ;;  %v2351_v9 = vld [vmem:[%s3061_s0 + $0x30] sm:$0xff]  }
   0x4   :  { %2253 = vmatprep.subr.bf16.mxu0 %v2344_v1  ;;  %v2352_v10 = vld [vmem:[%s3061_s0 + $0x38] sm:$0xff]   ;;  %v2353_v11 = vld [vmem:[%s3061_s0 + $0x40] sm:$0xff]   ;;  %v830_v22 = vld [vmem:[%s3065_s4 + $0x8] sm:$0xff] }
   0x5   :  { %v829_v12 = vld [vmem:[%s3065_s4] sm:$0xff]  ;;  %v834_v23 = vld [vmem:[%s3065_s4 + $0x28] sm:$0xff]  ;;  %v2355_v28 = vld [vmem:[%s3061_s0 + $0x50] sm:$0xff]  }
   0x6   :  { %v833_v13 = vld [vmem:[%s3065_s4 + $0x20] sm:$0xff]  ;;  %v2354_v24 = vld [vmem:[%s3061_s0 + $0x48] sm:$0xff]   ;;  %v2026_v31 = vcombine.high %v830_v22, %v834_v23  ;;  %v2356_v36 = vld [vmem:[%s3061_s0 + $0x58] sm:$0xff]   ;;  %v2025_v57 = vcombine.low %v830_v22, %v834_v23 }
   0x7   :  { %2254 = vmatpush3.bf16.msra.mxu0 %v2344_v1  ;;  %v837_v14 = vld [vmem:[%s3065_s4 + $0x40] sm:$0xff]  ;;  %v2024_v15 = vcombine.high %v829_v12, %v833_v13  ;;  %v2023_v16 = vcombine.low %v829_v12, %v833_v13  ;;  %v2358_v46 = vld [vmem:[%s3061_s0 + $0x68] sm:$0xff]   ;;  %v2359_v47 = vld [vmem:[%s3061_s0 + $0x70] sm:$0xff]  }
   0x8   :  { %v841_v17 = vld [vmem:[%s3065_s4 + $0x60] sm:$0xff]  ;;  %v838_v52 = vld [vmem:[%s3065_s4 + $0x48] sm:$0xff]  ;;  %v831_v58 = vld [vmem:[%s3065_s4 + $0x10] sm:$0xff] }
   0x9   :  { %v2117_v18 = vld [vmem:[%s3062_s1] sm:$0xff]   ;;  %v2032_v19 = vcombine.high %v837_v14, %v841_v17  ;;  %977 = vmatprep.subr.bf16.mxu1 %v2024_v15  ;;  %v2031_v25 = vcombine.low %v837_v14, %v841_v17  ;;  %v842_v53 = vld [vmem:[%s3065_s4 + $0x68] sm:$0xff]  ;;  %v835_v59 = vld [vmem:[%s3065_s4 + $0x30] sm:$0xff] }
   0xa   :  { %2256 = vmatmul.mubr.msk.bf16.vlgmr.msra.gmra.mrb[0].mxu0 %vm278_vm0, %v2346_v4  ;;  %v2118_v20 = vunpack.c.l.bf16 %v2117_v18  ;;  %v2119_v21 = vunpack.c.h.bf16 %v2117_v18  ;;  %978 = vmatpush1.bf16.msra.mxu1 %v2023_v16  ;;  %v2357_v37 = vld [vmem:[%s3061_s0 + $0x60] sm:$0xff]   ;;  %v2360_v60 = vld [vmem:[%s3061_s0 + $0x78] sm:$0xff]   ;;  %v2034_v62 = vcombine.high %v838_v52, %v842_v53  ;;  %v2033_v0 = vcombine.low %v838_v52, %v842_v53  ;;  %v839_v1 = vld [vmem:[%s3065_s4 + $0x50] sm:$0xff] }
   0xb   :  { %2259 = vmatprep.mubr.msk.bf16.mxu0 %vm278_vm0, %v2347_v5  ;;  %979 = vmatprep.subr.bf16.mxu1 %v2032_v19  ;;  %v2361_v63 = vld [vmem:[%s3061_s0 + $0x80] sm:$0xff]   ;;  %v843_v2 = vld [vmem:[%s3065_s4 + $0x70] sm:$0xff]  ;;  %v2028_v4 = vcombine.high %v831_v58, %v835_v59  ;;  %v2027_v5 = vcombine.low %v831_v58, %v835_v59  ;;  %v840_v12 = vld [vmem:[%s3065_s4 + $0x58] sm:$0xff] }
   0xc   :  { %v809_v26 = vsel %vm278_vm0, %v2118_v20, 0.0  ;;  %v816_v27 = vsel %vm278_vm0, %v2119_v21, 0.0  ;;  %v844_v13 = vld [vmem:[%s3065_s4 + $0x78] sm:$0xff]  ;;  %v2365_v18 = vld [vmem:[%s3061_s0 + $0xa0] sm:$0xff]   ;;  %v2366_v20 = vld [vmem:[%s3061_s0 + $0xa8] sm:$0xff]  }
   0xd   :  { %v810_v29 = vrot.slane %v809_v26, 4  ;;  %v817_v30 = vrot.slane %v816_v27, 4  ;;  %v2364_v16 = vld [vmem:[%s3061_s0 + $0x98] sm:$0xff]   ;;  %v2038_v17 = vcombine.high %v840_v12, %v844_v13  ;;  %v2037_v19 = vcombine.low %v840_v12, %v844_v13  ;;  %v2367_v21 = vld [vmem:[%s3061_s0 + $0xb0] sm:$0xff]  }
   0xe   :  { %980 = vmatpush1.bf16.msra.mxu1 %v2031_v25 }
   0xf   :  { %v811_v32 = vadd.f32 %v810_v29, %v809_v26  ;;  %v818_v33 = vadd.f32 %v817_v30, %v816_v27  ;;  %1018 = vmatprep.subr.bf16.mxu1 %v2026_v31 }
  0x11   :  { %v812_v34 = vrot.slane %v811_v32, 2  ;;  %v819_v35 = vrot.slane %v818_v33, 2 }
  0x12   :  { %2260 = vmatmul.mubr.msk.bf16.gmra.mrb[4].mxu0 %vm278_vm0, %v2348_v6  ;;  %v832_v6 = vld [vmem:[%s3065_s4 + $0x18] sm:$0xff] }
  0x13   :  { %2263 = vmatprep.mubr.msk.bf16.mxu0 %vm278_vm0, %v2349_v7  ;;  %v813_v38 = vadd.f32 %v812_v34, %v811_v32  ;;  %v820_v39 = vadd.f32 %v819_v35, %v818_v33  ;;  %v836_v7 = vld [vmem:[%s3065_s4 + $0x38] sm:$0xff] }
  0x14   :  { %v2030_v14 = vcombine.high %v832_v6, %v836_v7  ;;  %v2029_v15 = vcombine.low %v832_v6, %v836_v7 }
  0x15   :  { %v814_v40 = vrot.slane %v813_v38, 1  ;;  %v821_v41 = vrot.slane %v820_v39, 1 }
  0x17   :  { %v815_v42 = vadd.f32 %v814_v40, %v813_v38  ;;  %v822_v43 = vadd.f32 %v821_v41, %v820_v39 }
  0x19   :  { %v823_v44 = vmax.f32 %v815_v42, 0.0  ;;  %v824_v45 = vmax.f32 %v822_v43, 0.0 }
  0x1a   :  { %2264 = vmatmul.mubr.msk.bf16.gmra.mrb[8].mxu0 %vm278_vm0, %v2350_v8  ;;  %v2362_v8 = vld [vmem:[%s3061_s0 + $0x88] sm:$0xff]  }
  0x1b   :  { %2267 = vmatprep.mubr.msk.bf16.mxu0 %vm278_vm0, %v2351_v9  ;;  %v825_v48 = vmin.f32 %v823_v44, 1.0  ;;  %v826_v49 = vmin.f32 %v824_v45, 1.0  ;;  %v2036_v9 = vcombine.high %v839_v1, %v843_v2 }
  0x1d   :  { %v827_v50 = vpack.c.bf16 %v825_v48, %v825_v48  ;;  %v828_v51 = vpack.c.bf16 %v826_v49, %v826_v49 }
  0x1f   :  { %v889_v54 = vunpack.c.l.b16 %v827_v50  ;;  %v890_v55 = vunpack.c.l.b16 %v828_v51 }
  0x21   :  { %v892_v56 = vsel %vm891_vm1, %v890_v55, %v889_v54 }
  0x22   :  { %2268 = vmatmul.mubr.msk.bf16.gmra.mrb[12].mxu0 %vm278_vm0, %v2352_v10  ;;  %v893_v61 = vpack.c.b16 %v892_v56, %v892_v56  ;;  %v2363_v10 = vld [vmem:[%s3061_s0 + $0x90] sm:$0xff]  }
  0x23   :  { %2271 = vmatprep.mubr.msk.bf16.mxu0 %vm278_vm0, %v2353_v11  ;;  %v2035_v11 = vcombine.low %v839_v1, %v843_v2 }
  0x24   :  { %2039 = vmatmul.mubr.msk.bf16.vlgmr.msra.gmra.mrb[0].mxu1 %vm278_vm0, %v893_v61 }
  0x25   :  { %1019 = vmatpush1.bf16.msra.mxu1 %v2025_v57  ;;  %1050 = vmatprep.mubr.bf16.mxu1 %v2473_v3 }
  0x26   :  { %1020 = vmatprep.subr.bf16.mxu1 %v2034_v62 }
  0x29   :  { %1021 = vmatpush1.bf16.msra.mxu1 %v2033_v0 }
  0x2a   :  { %2272 = vmatmul.mubr.msk.bf16.gmra.mrb[16].mxu0 %vm278_vm0, %v2354_v24  ;;  %1059 = vmatprep.subr.bf16.mxu1 %v2028_v4 }
  0x2b   :  { %2275 = vmatprep.mubr.msk.bf16.mxu0 %vm278_vm0, %v2355_v28 }
  0x2c   :  { %2040 = vmatmul.mubr.msk.bf16.vlgmr.msra.gmra.mrb[4].mxu1 %vm278_vm0, %v893_v61 }
  0x2d   :  { %1060 = vmatpush1.bf16.msra.mxu1 %v2027_v5  ;;  %1091 = vmatprep.mubr.bf16.mxu1 %v2473_v3 }
  0x2e   :  { %1061 = vmatprep.subr.bf16.mxu1 %v2036_v9 }
  0x31   :  { %1062 = vmatpush1.bf16.msra.mxu1 %v2035_v11 }
  0x32   :  { %2276 = vmatmul.mubr.msk.bf16.gmra.mrb[20].mxu0 %vm278_vm0, %v2356_v36  ;;  %1100 = vmatprep.subr.bf16.mxu1 %v2030_v14 }
  0x33   :  { %2279 = vmatprep.mubr.msk.bf16.mxu0 %vm278_vm0, %v2357_v37 }
  0x34   :  { %2041 = vmatmul.mubr.msk.bf16.vlgmr.msra.gmra.mrb[8].mxu1 %vm278_vm0, %v893_v61 }
  0x35   :  { %1101 = vmatpush1.bf16.msra.mxu1 %v2029_v15  ;;  %1132 = vmatprep.mubr.bf16.mxu1 %v2473_v3 }
  0x36   :  { %1102 = vmatprep.subr.bf16.mxu1 %v2038_v17 }
  0x39   :  { %1103 = vmatpush1.bf16.msra.mxu1 %v2037_v19 }
  0x3a   :  { %2280 = vmatmul.mubr.msk.bf16.gmra.mrb[24].mxu0 %vm278_vm0, %v2358_v46 }
  0x3b   :  { %2283 = vmatprep.mubr.msk.bf16.mxu0 %vm278_vm0, %v2359_v47 }
  0x3c   :  { %2042 = vmatmul.mubr.msk.bf16.vlgmr.msra.gmra.mrb[12].mxu1 %vm278_vm0, %v893_v61 }
  0x42   :  { %2284 = vmatmul.mubr.msk.bf16.gmra.mrb[28].mxu0 %vm278_vm0, %v2360_v60 }
  0x43   :  { %2287 = vmatprep.mubr.msk.bf16.mxu0 %vm278_vm0, %v2361_v63 }
  0x4a   :  { %2288 = vmatmul.mubr.msk.bf16.gmra.mrb[32].mxu0 %vm278_vm0, %v2362_v8 }
  0x4b   :  { %2291 = vmatprep.mubr.msk.bf16.mxu0 %vm278_vm0, %v2363_v10 }
  0x52   :  { %2292 = vmatmul.mubr.msk.bf16.gmra.mrb[36].mxu0 %vm278_vm0, %v2364_v16 }
  0x53   :  { %2295 = vmatprep.mubr.msk.bf16.mxu0 %vm278_vm0, %v2365_v18 }
  0x54   :  { %13 = vsyncpa [#allocation3], 0  ;;  %v2368_v3 = vld [vmem:[%s3061_s0 + $0xb8] sm:$0xff]   ;;  %v2369_v22 = vld [vmem:[%s3061_s0 + $0xc0] sm:$0xff]   ;;  %vm2475_vm2 = vmmov 0  }
  0x55   :  { %v2370_v23 = vld [vmem:[%s3061_s0 + $0xc8] sm:$0xff]   ;;  %v2371_v24 = vld [vmem:[%s3061_s0 + $0xd0] sm:$0xff]   ;;  %v2372_v25 = vld [vmem:[%s3061_s0 + $0xd8] sm:$0xff]  }
  0x56   :  { %v2373_v26 = vld [vmem:[%s3061_s0 + $0xe0] sm:$0xff]   ;;  %v2374_v27 = vld [vmem:[%s3061_s0 + $0xe8] sm:$0xff]   ;;  %v2375_v28 = vld [vmem:[%s3061_s0 + $0xf0] sm:$0xff]  }
  0x57   :  { %v2376_v29 = vld [vmem:[%s3061_s0 + $0xf8] sm:$0xff]   ;;  %v2379_v30 = vld [vmem:[%s3067_s6 + $0x40] sm:$0xff]   ;;  %v2381_v34 = vld [vmem:[%s3067_s6 + $0x48] sm:$0xff]  }
  0x58   :  { %v2380_v31 = vld [vmem:[%s3067_s6] sm:$0xff]   ;;  %2154 = vmatprep.subr.bf16.mxu1 %v2379_v30  ;;  %v2382_v35 = vld [vmem:[%s3067_s6 + $0x8] sm:$0xff]   ;;  %v2383_v38 = vld [vmem:[%s3067_s6 + $0x50] sm:$0xff]  }
  0x59   :  { %v2377_v32 = vld [vmem:[%s3067_s6 + $0x1c0] sm:$0xff]   ;;  %2155 = vmatpush3.bf16.msra.mxu1 %v2380_v31  ;;  %v2384_v40 = vld [vmem:[%s3067_s6 + $0x10] sm:$0xff]   ;;  %v2387_v46 = vld [vmem:[%s3067_s6 + $0x58] sm:$0xff]  }
  0x5a   :  { %2296 = vmatmul.mubr.msk.bf16.gmra.mrb[40].mxu0 %vm278_vm0, %v2366_v20  ;;  %v2378_v33 = vld [vmem:[%s3067_s6 + $0x180] sm:$0xff]   ;;  %2220 = vmatprep.subr.bf16.mxu0 %v2377_v32  ;;  %v2388_v47 = vld [vmem:[%s3067_s6 + $0x18] sm:$0xff]   ;;  %v2391_v2 = vld [vmem:[%s3067_s6 + $0x68] sm:$0xff]  }
  0x5b   :  { %2299 = vmatprep.mubr.msk.bf16.mxu0 %vm278_vm0, %v2367_v21  ;;  %2221 = vmatpush3.bf16.msra.mxu0 %v2378_v33  ;;  %v2739_v36 = vld [vmem:[%s3064_s3] ss:$0 sm:$0xff]  ;;  %v2392_v4 = vld [vmem:[%s3067_s6 + $0x28] sm:$0xff]   ;;  %v2393_v14 = vld [vmem:[%s3067_s6 + $0x70] sm:$0xff]  }
  0x5c   :  { %2156 = vmatprep.subr.bf16.mxu1 %v2381_v34  ;;  %v2389_v54 = vld [vmem:[%s3067_s6 + $0x60] sm:$0xff]   ;;  %v2385_v11 = vld [vmem:[%s3067_s6 + $0x1c8] sm:$0xff]   ;;  %v2394_v15 = vld [vmem:[%s3067_s6 + $0x30] sm:$0xff]  }
  0x5d   :  { %2157 = vmatpush3.bf16.msra.mxu1 %v2382_v35  ;;  %v2390_v56 = vld [vmem:[%s3067_s6 + $0x20] sm:$0xff]   ;;  %v2386_v12 = vld [vmem:[%s3067_s6 + $0x188] sm:$0xff]   ;;  %v2395_v16 = vld [vmem:[%s3067_s6 + $0x1d0] sm:$0xff]   ;;  %2222 = vmatprep.subr.bf16.mxu0 %v2385_v11 }
  0x5e   :  { %2158 = vmatprep.subr.bf16.mxu1 %v2383_v38  ;;  %v2397_v21 = vld [vmem:[%s3067_s6 + $0x78] sm:$0xff]  }
  0x5f   :  { %2223 = vmatpush3.bf16.msra.mxu0 %v2386_v12 }
  0x60   :  { %2224 = vmatprep.subr.bf16.mxu0 %v2395_v16 }
  0x61   :  { %2159 = vmatpush3.bf16.msra.mxu1 %v2384_v40 }
  0x62   :  { %2300 = vmatmul.mubr.msk.bf16.gmra.mrb[44].mxu0 %vm278_vm0, %v2368_v3  ;;  %2160 = vmatprep.subr.bf16.mxu1 %v2387_v46 }
  0x63   :  { %2303 = vmatprep.mubr.msk.bf16.mxu0 %vm278_vm0, %v2369_v22  ;;  %v2396_v22 = vld [vmem:[%s3067_s6 + $0x190] sm:$0xff]  }
  0x64   :  { %2225 = vmatpush3.bf16.msra.mxu0 %v2396_v22  ;;  %v2828_v22 = vld [vmem:[%s3066_s5] sm:$0xff] }
  0x65   :  { %2161 = vmatpush3.bf16.msra.mxu1 %v2388_v47 }
  0x66   :  { %2162 = vmatprep.subr.bf16.mxu1 %v2389_v54 }
  0x69   :  { %2163 = vmatpush3.bf16.msra.mxu1 %v2390_v56 }
  0x6a   :  { %2304 = vmatmul.mubr.msk.bf16.gmra.mrb[48].mxu0 %vm278_vm0, %v2370_v23  ;;  %2164 = vmatprep.subr.bf16.mxu1 %v2391_v2 }
  0x6b   :  { %2307 = vmatprep.mubr.msk.bf16.mxu0 %vm278_vm0, %v2371_v24 }
  0x6d   :  { %2165 = vmatpush3.bf16.msra.mxu1 %v2392_v4 }
  0x6e   :  { %2166 = vmatprep.subr.bf16.mxu1 %v2393_v14 }
  0x71   :  { %2167 = vmatpush3.bf16.msra.mxu1 %v2394_v15 }
  0x72   :  { %2308 = vmatmul.mubr.msk.bf16.gmra.mrb[52].mxu0 %vm278_vm0, %v2372_v25  ;;  %2168 = vmatprep.subr.bf16.mxu1 %v2397_v21 }
  0x73   :  { %2311 = vmatprep.mubr.msk.bf16.mxu0 %vm278_vm0, %v2373_v26 }
  0x7a   :  { %2312 = vmatmul.mubr.msk.bf16.gmra.mrb[56].mxu0 %vm278_vm0, %v2374_v27  ;;  %v2398_v27 = vld [vmem:[%s3067_s6 + $0x38] sm:$0xff]  }
  0x7b   :  { %2315 = vmatprep.mubr.msk.bf16.mxu0 %vm278_vm0, %v2375_v28  ;;  %v2399_v28 = vld [vmem:[%s3067_s6 + $0xc0] sm:$0xff]   ;;  %2169 = vmatpush3.bf16.msra.mxu1 %v2398_v27 }
  0x7c   :  { %2176 = vmatprep.subr.bf16.mxu1 %v2399_v28 }
  0x82   :  { %2316 = vmatmul.mubr.msk.bf16.gmra.mrb[60].mxu0 %vm278_vm0, %v2376_v29 }
  0xdd   :  { %v2257_v37 = vpop.f32.mrb[0].mxu0 }
  0xde   :  { %v409_v39 = vpop.f32.mrb[1].mxu0  ;;  %v418_v44 = vadd.f32 %v2257_v37, %v2739_v36 }
  0xdf   :  { %v410_v41 = vadd.f32 %v2739_v36, %v409_v39  ;;  %v2258_v42 = vpop.f32.mrb[2].mxu0 }
  0xe0   :  { %v412_v43 = vpop.f32.mrb[3].mxu0  ;;  %v421_v49 = vadd.f32 %v2258_v42, %v2739_v36  ;;  %v666_v51 = vmax.f32 %v418_v44, 0.0 }
  0xe1   :  { %v413_v45 = vadd.f32 %v2739_v36, %v412_v43  ;;  %v664_v48 = vmax.f32 %v410_v41, 0.0 }
  0xe2   :  { %v667_v57 = vmax.f32 %v421_v49, 0.0 }
  0xe3   :  { %v665_v50 = vmax.f32 %v413_v45, 0.0 }
  0xe5   :  { %v728_v52 = vadd.f32 %v665_v50, %v664_v48  ;;  %v2261_v53 = vpop.f32.mrb[4].mxu0 }
  0xe6   :  { %v425_v55 = vpop.f32.mrb[5].mxu0  ;;  %v434_v62 = vadd.f32 %v2261_v53, %v2739_v36 }
  0xe7   :  { %v729_v58 = vadd.f32 %v728_v52, %v666_v51  ;;  %v426_v59 = vadd.f32 %v2739_v36, %v425_v55  ;;  %v2262_v60 = vpop.f32.mrb[6].mxu0 }
  0xe8   :  { %v428_v61 = vpop.f32.mrb[7].mxu0  ;;  %v437_v6 = vadd.f32 %v2262_v60, %v2739_v36  ;;  %v670_v8 = vmax.f32 %v434_v62, 0.0  ;;  %v2405_v62 = vld [vmem:[%s3067_s6 + $0x1d8] sm:$0xff]  }
  0xe9   :  { %v668_v63 = vmax.f32 %v426_v59, 0.0  ;;  %v730_v0 = vadd.f32 %v729_v58, %v667_v57  ;;  %v429_v1 = vadd.f32 %v2739_v36, %v428_v61  ;;  %2226 = vmatprep.subr.bf16.mxu0 %v2405_v62 }
  0xea   :  { %v671_v17 = vmax.f32 %v437_v6, 0.0 }
  0xeb   :  { %v731_v5 = vadd.f32 %v730_v0, %v668_v63  ;;  %v669_v7 = vmax.f32 %v429_v1, 0.0  ;;  %v2406_v63 = vld [vmem:[%s3067_s6 + $0x198] sm:$0xff]   ;;  %v847_v0 = vlaneseq }
  0xec   :  { %2227 = vmatpush3.bf16.msra.mxu0 %v2406_v63 }
  0xed   :  { %v732_v9 = vadd.f32 %v731_v5, %v669_v7  ;;  %v2265_v10 = vpop.f32.mrb[8].mxu0 }
  0xee   :  { %v441_v13 = vpop.f32.mrb[9].mxu0  ;;  %v450_v23 = vadd.f32 %v2265_v10, %v2739_v36 }
  0xef   :  { %v733_v18 = vadd.f32 %v732_v9, %v670_v8  ;;  %v442_v19 = vadd.f32 %v2739_v36, %v441_v13  ;;  %v2266_v20 = vpop.f32.mrb[10].mxu0  ;;  %v2818_v9 = vshrl.u32 %v847_v0, 7 }
  0xf0   :  { %v444_v3 = vpop.f32.mrb[11].mxu0  ;;  %v453_v30 = vadd.f32 %v2266_v20, %v2739_v36  ;;  %v674_v32 = vmax.f32 %v450_v23, 0.0 }
  0xf1   :  { %v672_v24 = vmax.f32 %v442_v19, 0.0  ;;  %v734_v25 = vadd.f32 %v733_v18, %v671_v17  ;;  %v445_v26 = vadd.f32 %v2739_v36, %v444_v3  ;;  %v849_v19 = vsub.s32 0, %v2818_v9 }
  0xf2   :  { %v675_v37 = vmax.f32 %v453_v30, 0.0 }
  0xf3   :  { %v735_v29 = vadd.f32 %v734_v25, %v672_v24  ;;  %v673_v31 = vmax.f32 %v445_v26, 0.0  ;;  %v850_v27 = vrot.slane %v2828_v22, %v849_v19  ;;  %v2425_v19 = vld [vmem:[%s3067_s6 + $0x1e8] sm:$0xff]  }
  0xf5   :  { %v736_v33 = vadd.f32 %v735_v29, %v673_v31  ;;  %v2269_v34 = vpop.f32.mrb[12].mxu0 }
  0xf6   :  { %v457_v35 = vpop.f32.mrb[13].mxu0  ;;  %v466_v42 = vadd.f32 %v2269_v34, %v2739_v36 }
  0xf7   :  { %v737_v38 = vadd.f32 %v736_v33, %v674_v32  ;;  %v458_v39 = vadd.f32 %v2739_v36, %v457_v35  ;;  %v2270_v40 = vpop.f32.mrb[14].mxu0 }
  0xf8   :  { %v460_v41 = vpop.f32.mrb[15].mxu0  ;;  %v469_v47 = vadd.f32 %v2270_v40, %v2739_v36  ;;  %v678_v49 = vmax.f32 %v466_v42, 0.0  ;;  %v2416_v40 = vld [vmem:[%s3067_s6 + $0x1a0] sm:$0xff]  }
  0xf9   :  { %v676_v43 = vmax.f32 %v458_v39, 0.0  ;;  %v738_v44 = vadd.f32 %v737_v38, %v675_v37  ;;  %v461_v45 = vadd.f32 %v2739_v36, %v460_v41  ;;  %v1011_v38 = vpop.f32.mrb[0].mxu1  ;;  %v2415_v39 = vld [vmem:[%s3067_s6 + $0x1e0] sm:$0xff]  }
  0xfa   :  { %v679_v53 = vmax.f32 %v469_v47, 0.0  ;;  %v1012_v41 = vadd.f32 %v1011_v38, %v850_v27  ;;  %v2840_v42 = vpop.f32.mrb[1].mxu1  ;;  %2228 = vmatprep.subr.bf16.mxu0 %v2415_v39  ;;  %v869_v39 = vsub.s32 5, %v2818_v9 }
  0xfb   :  { %v739_v46 = vadd.f32 %v738_v44, %v676_v43  ;;  %v677_v48 = vmax.f32 %v461_v45, 0.0  ;;  %2229 = vmatpush3.bf16.msra.mxu0 %v2416_v40 }
  0xfc   :  { %v1143_v47 = vpack.c.bf16 %v1012_v41, %v1012_v41  ;;  %2230 = vmatprep.subr.bf16.mxu0 %v2425_v19 }
  0xfd   :  { %v740_v50 = vadd.f32 %v739_v46, %v677_v48  ;;  %v2273_v51 = vpop.f32.mrb[16].mxu0  ;;  %v1015_v46 = vpop.f32.mrb[2].mxu1 }
  0xfe   :  { %v473_v52 = vpop.f32.mrb[17].mxu0  ;;  %v482_v58 = vadd.f32 %v2273_v51, %v2739_v36  ;;  %v1016_v48 = vpop.f32.mrb[3].mxu1  ;;  %1773 = vmatprep.mubr.bf16.mxu1 %v1143_v47  ;;  %v2433_v46 = vld [vmem:[%s3067_s6 + $0x1f0] sm:$0xff]   ;;  %v870_v47 = vrot.slane %v2828_v22, %v869_v39 }
  0xff   :  { %v741_v54 = vadd.f32 %v740_v50, %v678_v49  ;;  %v474_v55 = vadd.f32 %v2739_v36, %v473_v52  ;;  %v2274_v56 = vpop.f32.mrb[18].mxu0  ;;  %v2846_v62 = vpop.f32.mrb[4].mxu1 }
 0x100   :  { %v476_v57 = vpop.f32.mrb[19].mxu0  ;;  %v485_v2 = vadd.f32 %v2274_v56, %v2739_v36  ;;  %v682_v5 = vmax.f32 %v482_v58, 0.0  ;;  %v2848_v63 = vpop.f32.mrb[5].mxu1 }
 0x101   :  { %v680_v59 = vmax.f32 %v474_v55, 0.0  ;;  %v742_v60 = vadd.f32 %v741_v54, %v679_v53  ;;  %v477_v61 = vadd.f32 %v2739_v36, %v476_v57 }
 0x102   :  { %v683_v10 = vmax.f32 %v485_v2, 0.0 }
 0x103   :  { %v743_v1 = vadd.f32 %v742_v60, %v680_v59  ;;  %v681_v4 = vmax.f32 %v477_v61, 0.0 }
 0x105   :  { %v744_v6 = vadd.f32 %v743_v1, %v681_v4  ;;  %v2277_v7 = vpop.f32.mrb[20].mxu0  ;;  %v1056_v4 = vpop.f32.mrb[6].mxu1 }
 0x106   :  { %v489_v8 = vpop.f32.mrb[21].mxu0  ;;  %v498_v15 = vadd.f32 %v2277_v7, %v2739_v36 }
 0x107   :  { %v745_v11 = vadd.f32 %v744_v6, %v682_v5  ;;  %v490_v12 = vadd.f32 %v2739_v36, %v489_v8  ;;  %v2278_v13 = vpop.f32.mrb[22].mxu0  ;;  %v1057_v5 = vpop.f32.mrb[7].mxu1 }
 0x108   :  { %v492_v14 = vpop.f32.mrb[23].mxu0  ;;  %v501_v21 = vadd.f32 %v2278_v13, %v2739_v36  ;;  %v686_v23 = vmax.f32 %v498_v15, 0.0  ;;  %v2866_v38 = vpop.f32.mrb[8].mxu1 }
 0x109   :  { %v684_v16 = vmax.f32 %v490_v12, 0.0  ;;  %v746_v17 = vadd.f32 %v745_v11, %v683_v10  ;;  %v493_v18 = vadd.f32 %v2739_v36, %v492_v14  ;;  %v1095_v40 = vpop.f32.mrb[9].mxu1 }
 0x10a   :  { %v687_v28 = vmax.f32 %v501_v21, 0.0 }
 0x10b   :  { %v747_v20 = vadd.f32 %v746_v17, %v684_v16  ;;  %v685_v3 = vmax.f32 %v493_v18, 0.0 }
 0x10d   :  { %v748_v24 = vadd.f32 %v747_v20, %v685_v3  ;;  %v2281_v25 = vpop.f32.mrb[24].mxu0  ;;  %v2426_v20 = vld [vmem:[%s3067_s6 + $0x1a8] sm:$0xff]  }
 0x10e   :  { %v505_v26 = vpop.f32.mrb[25].mxu0  ;;  %v514_v33 = vadd.f32 %v2281_v25, %v2739_v36  ;;  %2231 = vmatpush3.bf16.msra.mxu0 %v2426_v20 }
 0x10f   :  { %v749_v29 = vadd.f32 %v748_v24, %v686_v23  ;;  %v506_v30 = vadd.f32 %v2739_v36, %v505_v26  ;;  %v2282_v31 = vpop.f32.mrb[26].mxu0  ;;  %2232 = vmatprep.subr.bf16.mxu0 %v2433_v46 }
 0x110   :  { %v508_v32 = vpop.f32.mrb[27].mxu0  ;;  %v517_v44 = vadd.f32 %v2282_v31, %v2739_v36  ;;  %v690_v49 = vmax.f32 %v514_v33, 0.0 }
 0x111   :  { %v688_v34 = vmax.f32 %v506_v30, 0.0  ;;  %v750_v35 = vadd.f32 %v749_v29, %v687_v28  ;;  %v509_v37 = vadd.f32 %v2739_v36, %v508_v32 }
 0x112   :  { %v691_v53 = vmax.f32 %v517_v44, 0.0 }
 0x113   :  { %v751_v43 = vadd.f32 %v750_v35, %v688_v34  ;;  %v689_v45 = vmax.f32 %v509_v37, 0.0 }
 0x115   :  { %v752_v50 = vadd.f32 %v751_v43, %v689_v45  ;;  %v2285_v51 = vpop.f32.mrb[28].mxu0  ;;  %v1097_v45 = vpop.f32.mrb[10].mxu1 }
 0x116   :  { %v521_v52 = vpop.f32.mrb[29].mxu0  ;;  %v530_v58 = vadd.f32 %v2285_v51, %v2739_v36  ;;  %v1098_v48 = vpop.f32.mrb[11].mxu1 }
 0x117   :  { %v753_v54 = vadd.f32 %v752_v50, %v690_v49  ;;  %v522_v55 = vadd.f32 %v2739_v36, %v521_v52  ;;  %v2286_v56 = vpop.f32.mrb[30].mxu0  ;;  %v2434_v49 = vld [vmem:[%s3067_s6 + $0x1b0] sm:$0xff]   ;;  %v873_v50 = vsub.s32 6, %v2818_v9 }
 0x118   :  { %v524_v57 = vpop.f32.mrb[31].mxu0  ;;  %v533_v1 = vadd.f32 %v2286_v56, %v2739_v36  ;;  %v694_v6 = vmax.f32 %v530_v58, 0.0  ;;  %2233 = vmatpush3.bf16.msra.mxu0 %v2434_v49 }
 0x119   :  { %v692_v59 = vmax.f32 %v522_v55, 0.0  ;;  %v754_v60 = vadd.f32 %v753_v54, %v691_v53  ;;  %v525_v61 = vadd.f32 %v2739_v36, %v524_v57  ;;  %v1134_v54 = vpop.f32.mrb[12].mxu1  ;;  %v874_v56 = vrot.slane %v2828_v22, %v873_v50 }
 0x11a   :  { %v695_v11 = vmax.f32 %v533_v1, 0.0 }
 0x11b   :  { %v755_v0 = vadd.f32 %v754_v60, %v692_v59  ;;  %v693_v2 = vmax.f32 %v525_v61, 0.0  ;;  %v1096_v61 = vadd.f32 %v1095_v40, %v870_v47 }
 0x11d   :  { %v756_v7 = vadd.f32 %v755_v0, %v693_v2  ;;  %v2289_v8 = vpop.f32.mrb[32].mxu0  ;;  %v2437_v0 = vld [vmem:[%s3067_s6 + $0x1f8] sm:$0xff]  }
 0x11e   :  { %v537_v10 = vpop.f32.mrb[33].mxu0  ;;  %v546_v17 = vadd.f32 %v2289_v8, %v2739_v36  ;;  %v2438_v2 = vld [vmem:[%s3067_s6 + $0x1b8] sm:$0xff]   ;;  %2234 = vmatprep.subr.bf16.mxu0 %v2437_v0  ;;  %v1135_v8 = vadd.f32 %v1134_v54, %v874_v56 }
 0x11f   :  { %v757_v12 = vadd.f32 %v756_v7, %v694_v6  ;;  %v538_v13 = vadd.f32 %v2739_v36, %v537_v10  ;;  %v2290_v14 = vpop.f32.mrb[34].mxu0  ;;  %2235 = vmatpush3.bf16.msra.mxu0 %v2438_v2  ;;  %v2900_v2 = vpop.f32.mrb[13].mxu1 }
 0x120   :  { %v540_v15 = vpop.f32.mrb[35].mxu0  ;;  %v549_v3 = vadd.f32 %v2290_v14, %v2739_v36  ;;  %v698_v24 = vmax.f32 %v546_v17, 0.0  ;;  %v1149_v14 = vpack.c.bf16 %v1135_v8, %v1135_v8 }
 0x121   :  { %v2852_v16 = vadd.f32 %v757_v12, %v695_v11  ;;  %v541_v18 = vadd.f32 %v2739_v36, %v540_v15  ;;  %v696_v21 = vmax.f32 %v538_v13, 0.0  ;;  %v1148_v13 = vpack.c.bf16 %v1096_v61, %v1096_v61 }
 0x122   :  { %v699_v28 = vmax.f32 %v549_v3, 0.0  ;;  %1893 = vmatprep.mubr.bf16.mxu0 %v1149_v14 }
 0x123   :  { %v697_v23 = vmax.f32 %v541_v18, 0.0  ;;  %1894 = vmatmul.mubr.bf16.vlgmr.msra.gmra.mrb[64].mxu0 %v1148_v13 }
 0x125   :  { %v765_v25 = vadd.f32 %v697_v23, %v696_v21  ;;  %v2293_v26 = vpop.f32.mrb[36].mxu0 }
 0x126   :  { %v553_v27 = vpop.f32.mrb[37].mxu0  ;;  %v562_v33 = vadd.f32 %v2293_v26, %v2739_v36 }
 0x127   :  { %v766_v29 = vadd.f32 %v765_v25, %v698_v24  ;;  %v554_v30 = vadd.f32 %v2739_v36, %v553_v27  ;;  %v2294_v31 = vpop.f32.mrb[38].mxu0 }
 0x128   :  { %v556_v32 = vpop.f32.mrb[39].mxu0  ;;  %v565_v43 = vadd.f32 %v2294_v31, %v2739_v36  ;;  %v702_v51 = vmax.f32 %v562_v33, 0.0 }
 0x129   :  { %v700_v34 = vmax.f32 %v554_v30, 0.0  ;;  %v767_v35 = vadd.f32 %v766_v29, %v699_v28  ;;  %v557_v37 = vadd.f32 %v2739_v36, %v556_v32 }
 0x12a   :  { %v703_v57 = vmax.f32 %v565_v43, 0.0 }
 0x12b   :  { %v768_v41 = vadd.f32 %v767_v35, %v700_v34  ;;  %v701_v44 = vmax.f32 %v557_v37, 0.0 }
 0x12d   :  { %v769_v52 = vadd.f32 %v768_v41, %v701_v44  ;;  %v2297_v53 = vpop.f32.mrb[40].mxu0 }
 0x12e   :  { %v569_v55 = vpop.f32.mrb[41].mxu0  ;;  %v578_v4 = vadd.f32 %v2297_v53, %v2739_v36 }
 0x12f   :  { %v770_v58 = vadd.f32 %v769_v52, %v702_v51  ;;  %v570_v59 = vadd.f32 %v2739_v36, %v569_v55  ;;  %v2298_v60 = vpop.f32.mrb[42].mxu0 }
 0x130   :  { %v572_v1 = vpop.f32.mrb[43].mxu0  ;;  %v581_v11 = vadd.f32 %v2298_v60, %v2739_v36  ;;  %v706_v15 = vmax.f32 %v578_v4, 0.0  ;;  %v1138_v4 = vpop.f32.mrb[14].mxu1 }
 0x131   :  { %v704_v5 = vmax.f32 %v570_v59, 0.0  ;;  %v771_v6 = vadd.f32 %v770_v58, %v703_v57  ;;  %v573_v7 = vadd.f32 %v2739_v36, %v572_v1  ;;  %v1139_v8 = vpop.f32.mrb[15].mxu1 }
 0x132   :  { %v707_v20 = vmax.f32 %v581_v11, 0.0 }
 0x133   :  { %v772_v10 = vadd.f32 %v771_v6, %v704_v5  ;;  %v705_v12 = vmax.f32 %v573_v7, 0.0 }
 0x135   :  { %v773_v17 = vadd.f32 %v772_v10, %v705_v12  ;;  %v2301_v18 = vpop.f32.mrb[44].mxu0 }
 0x136   :  { %v585_v19 = vpop.f32.mrb[45].mxu0  ;;  %v594_v25 = vadd.f32 %v2301_v18, %v2739_v36 }
 0x137   :  { %v774_v21 = vadd.f32 %v773_v17, %v706_v15  ;;  %v586_v3 = vadd.f32 %v2739_v36, %v585_v19  ;;  %v2302_v23 = vpop.f32.mrb[46].mxu0 }
 0x138   :  { %v588_v24 = vpop.f32.mrb[47].mxu0  ;;  %v597_v30 = vadd.f32 %v2302_v23, %v2739_v36  ;;  %v710_v32 = vmax.f32 %v594_v25, 0.0 }
 0x139   :  { %v708_v26 = vmax.f32 %v586_v3, 0.0  ;;  %v775_v27 = vadd.f32 %v774_v21, %v707_v20  ;;  %v589_v28 = vadd.f32 %v2739_v36, %v588_v24  ;;  %v759_v24 = vrot.slane %v2852_v16, 4 }
 0x13a   :  { %v711_v37 = vmax.f32 %v597_v30, 0.0 }
 0x13b   :  { %v776_v29 = vadd.f32 %v775_v27, %v708_v26  ;;  %v709_v31 = vmax.f32 %v589_v28, 0.0 }
 0x13d   :  { %v777_v33 = vadd.f32 %v776_v29, %v709_v31  ;;  %v2305_v34 = vpop.f32.mrb[48].mxu0 }
 0x13e   :  { %v601_v35 = vpop.f32.mrb[49].mxu0  ;;  %v610_v44 = vadd.f32 %v2305_v34, %v2739_v36 }
 0x13f   :  { %v778_v39 = vadd.f32 %v777_v33, %v710_v32  ;;  %v602_v40 = vadd.f32 %v2739_v36, %v601_v35  ;;  %v2306_v41 = vpop.f32.mrb[50].mxu0  ;;  %v760_v32 = vadd.f32 %v759_v24, %v2852_v16  ;;  %v2412_v24 = vld [vmem:[%s3067_s6 + $0xa8] sm:$0xff]  }
 0x140   :  { %v604_v43 = vpop.f32.mrb[51].mxu0  ;;  %v613_v49 = vadd.f32 %v2306_v41, %v2739_v36  ;;  %v714_v51 = vmax.f32 %v610_v44, 0.0 }
 0x141   :  { %v712_v45 = vmax.f32 %v602_v40, 0.0  ;;  %v779_v46 = vadd.f32 %v778_v39, %v711_v37  ;;  %v605_v47 = vadd.f32 %v2739_v36, %v604_v43 }
 0x142   :  { %v715_v55 = vmax.f32 %v613_v49, 0.0 }
 0x143   :  { %v780_v48 = vadd.f32 %v779_v46, %v712_v45  ;;  %v713_v50 = vmax.f32 %v605_v47, 0.0  ;;  %v761_v45 = vrot.slane %v760_v32, 2 }
 0x145   :  { %v781_v52 = vadd.f32 %v780_v48, %v713_v50  ;;  %v2309_v53 = vpop.f32.mrb[52].mxu0  ;;  %v762_v16 = vadd.f32 %v761_v45, %v760_v32  ;;  %v2418_v32 = vld [vmem:[%s3067_s6 + $0xb8] sm:$0xff]  }
 0x146   :  { %v617_v54 = vpop.f32.mrb[53].mxu0  ;;  %v626_v60 = vadd.f32 %v2309_v53, %v2739_v36  ;;  %v2428_v45 = vld [vmem:[%s3067_s6 + $0x118] sm:$0xff]  }
 0x147   :  { %v782_v56 = vadd.f32 %v781_v52, %v714_v51  ;;  %v618_v57 = vadd.f32 %v2739_v36, %v617_v54  ;;  %v2310_v58 = vpop.f32.mrb[54].mxu0  ;;  %v763_v54 = vrot.slane %v762_v16, 1 }
 0x148   :  { %v620_v59 = vpop.f32.mrb[55].mxu0  ;;  %v629_v6 = vadd.f32 %v2310_v58, %v2739_v36  ;;  %v718_v10 = vmax.f32 %v626_v60, 0.0  ;;  %v857_v60 = vsub.s32 2, %v2818_v9 }
 0x149   :  { %v716_v61 = vmax.f32 %v618_v57, 0.0  ;;  %v783_v0 = vadd.f32 %v782_v56, %v715_v55  ;;  %v621_v1 = vadd.f32 %v2739_v36, %v620_v59  ;;  %v764_v57 = vadd.f32 %v763_v54, %v762_v16  ;;  %v2435_v16 = vld [vmem:[%s3067_s6 + $0x170] sm:$0xff]   ;;  %v2440_v54 = vld [vmem:[%s3067_s6 + $0x138] sm:$0xff]  }
 0x14a   :  { %v719_v14 = vmax.f32 %v629_v6, 0.0 }
 0x14b   :  { %v784_v5 = vadd.f32 %v783_v0, %v716_v61  ;;  %v717_v7 = vmax.f32 %v621_v1, 0.0  ;;  %v803_v0 = vmul.f32 0.00390625, %v764_v57 }
 0x14d   :  { %v785_v11 = vadd.f32 %v784_v5, %v717_v7  ;;  %v2313_v12 = vpop.f32.mrb[56].mxu0  ;;  %v1141_v5 = vpack.c.bf16 %v803_v0, %v803_v0  ;;  %v2446_v0 = vld [vmem:[%s3067_s6 + $0x228] sm:$0xff]  }
 0x14e   :  { %v633_v13 = vpop.f32.mrb[57].mxu0  ;;  %v642_v20 = vadd.f32 %v2313_v12, %v2739_v36  ;;  %v2400_v12 = vld [vmem:[%s3067_s6 + $0x80] sm:$0xff]  }
 0x14f   :  { %v786_v15 = vadd.f32 %v785_v11, %v718_v10  ;;  %v634_v17 = vadd.f32 %v2739_v36, %v633_v13  ;;  %v2314_v18 = vpop.f32.mrb[58].mxu0  ;;  %v1153_v8 = vunpack.c.l.b16 %v1141_v5  ;;  %v2448_v5 = vld [vmem:[%s3067_s6 + $0x238] sm:$0xff]  }
 0x150   :  { %v636_v19 = vpop.f32.mrb[59].mxu0  ;;  %v645_v26 = vadd.f32 %v2314_v18, %v2739_v36  ;;  %v722_v28 = vmax.f32 %v642_v20, 0.0  ;;  %v2404_v18 = vld [vmem:[%s3067_s6 + $0x90] sm:$0xff]   ;;  %v2408_v20 = vld [vmem:[%s3067_s6 + $0x98] sm:$0xff]  }
 0x151   :  { %v720_v21 = vmax.f32 %v634_v17, 0.0  ;;  %v787_v3 = vadd.f32 %v786_v15, %v719_v14  ;;  %v637_v23 = vadd.f32 %v2739_v36, %v636_v19  ;;  %v2401_v15 = vld [vmem:[%s3067_s6 + $0xc8] sm:$0xff]   ;;  %v2403_v17 = vld [vmem:[%s3067_s6 + $0xd0] sm:$0xff]   ;;  %v2407_v19 = vld [vmem:[%s3067_s6 + $0xd8] sm:$0xff]  }
 0x152   :  { %v723_v33 = vmax.f32 %v645_v26, 0.0  ;;  %v853_v26 = vsub.s32 1, %v2818_v9 }
 0x153   :  { %v788_v25 = vadd.f32 %v787_v3, %v720_v21  ;;  %v721_v27 = vmax.f32 %v637_v23, 0.0  ;;  %v2409_v21 = vld [vmem:[%s3067_s6 + $0xe0] sm:$0xff]   ;;  %v2411_v23 = vld [vmem:[%s3067_s6 + $0xe8] sm:$0xff]  }
 0x154   :  { %v2410_v3 = vld [vmem:[%s3067_s6 + $0xa0] sm:$0xff]  }
 0x155   :  { %v789_v29 = vadd.f32 %v788_v25, %v721_v27  ;;  %v2317_v30 = vpop.f32.mrb[60].mxu0  ;;  %v865_v25 = vsub.s32 4, %v2818_v9  ;;  %v2413_v27 = vld [vmem:[%s3067_s6 + $0xf0] sm:$0xff]  }
 0x156   :  { %v649_v31 = vpop.f32.mrb[61].mxu0  ;;  %v658_v40 = vadd.f32 %v2317_v30, %v2739_v36  ;;  %v854_v30 = vrot.slane %v2828_v22, %v853_v26 }
 0x157   :  { %v790_v34 = vadd.f32 %v789_v29, %v722_v28  ;;  %v650_v35 = vadd.f32 %v2739_v36, %v649_v31  ;;  %v2318_v37 = vpop.f32.mrb[62].mxu0  ;;  %v2414_v28 = vld [vmem:[%s3067_s6 + $0xb0] sm:$0xff]   ;;  %v866_v29 = vrot.slane %v2828_v22, %v865_v25  ;;  %v2417_v31 = vld [vmem:[%s3067_s6 + $0xf8] sm:$0xff]  }
 0x158   :  { %v652_v39 = vpop.f32.mrb[63].mxu0  ;;  %v661_v47 = vadd.f32 %v2318_v37, %v2739_v36  ;;  %v726_v49 = vmax.f32 %v658_v40, 0.0  ;;  %v2420_v37 = vld [vmem:[%s3067_s6 + $0x100] sm:$0xff]  }
 0x159   :  { %v724_v41 = vmax.f32 %v650_v35, 0.0  ;;  %v791_v43 = vadd.f32 %v790_v34, %v723_v33  ;;  %v653_v44 = vadd.f32 %v2739_v36, %v652_v39  ;;  %v858_v36 = vrot.slane %v2828_v22, %v857_v60  ;;  %v2419_v35 = vld [vmem:[%s3067_s6 + $0x140] sm:$0xff]   ;;  %v2444_v60 = vld [vmem:[%s3067_s6 + $0x218] sm:$0xff]  }
 0x15a   :  { %v727_v51 = vmax.f32 %v661_v47, 0.0  ;;  %v1094_v33 = vadd.f32 %v2866_v38, %v866_v29  ;;  %v1014_v34 = vadd.f32 %v2840_v42, %v854_v30  ;;  %v2422_v42 = vld [vmem:[%s3067_s6 + $0x108] sm:$0xff]   ;;  %v2423_v38 = vld [vmem:[%s3067_s6 + $0x150] sm:$0xff]   ;;  %v2430_v47 = vld [vmem:[%s3067_s6 + $0x120] sm:$0xff]  }
 0x15b   :  { %v792_v46 = vadd.f32 %v791_v43, %v724_v41  ;;  %v725_v48 = vmax.f32 %v653_v44, 0.0  ;;  %v1053_v7 = vadd.f32 %v2846_v62, %v858_v36  ;;  %v2402_v62 = vld [vmem:[%s3067_s6 + $0x88] sm:$0xff]   ;;  %v2424_v43 = vld [vmem:[%s3067_s6 + $0x110] sm:$0xff]   ;;  %v2427_v44 = vld [vmem:[%s3067_s6 + $0x158] sm:$0xff]  }
 0x15c   :  { %v1147_v39 = vpack.c.bf16 %v1094_v33, %v1094_v33  ;;  %v1144_v40 = vpack.c.bf16 %v1014_v34, %v1014_v34  ;;  %v2421_v41 = vld [vmem:[%s3067_s6 + $0x148] sm:$0xff]   ;;  %v2447_v36 = vld [vmem:[%s3067_s6 + $0x230] sm:$0xff]  }
 0x15d   :  { %v793_v50 = vadd.f32 %v792_v46, %v725_v48  ;;  %v1145_v13 = vpack.c.bf16 %v1053_v7, %v1053_v7  ;;  %v2429_v46 = vld [vmem:[%s3067_s6 + $0x160] sm:$0xff]   ;;  %v2431_v48 = vld [vmem:[%s3067_s6 + $0x168] sm:$0xff]  }
 0x15f   :  { %v794_v52 = vadd.f32 %v793_v50, %v726_v49  ;;  %v2432_v49 = vld [vmem:[%s3067_s6 + $0x128] sm:$0xff]   ;;  %v861_v50 = vsub.s32 3, %v2818_v9 }
 0x161   :  { %v795_v53 = vadd.f32 %v794_v52, %v727_v51  ;;  %v2436_v51 = vld [vmem:[%s3067_s6 + $0x130] sm:$0xff]   ;;  %v862_v52 = vrot.slane %v2828_v22, %v861_v50 }
 0x163   :  { %v796_v55 = vrot.slane %v795_v53, 4 }
 0x165   :  { %v797_v56 = vadd.f32 %v796_v55, %v795_v53  ;;  %v2439_v53 = vld [vmem:[%s3067_s6 + $0x178] sm:$0xff]   ;;  %v1055_v55 = vadd.f32 %v2848_v63, %v862_v52  ;;  %v2443_v63 = vld [vmem:[%s3067_s6 + $0x210] sm:$0xff]  }
 0x167   :  { %v798_v58 = vrot.slane %v797_v56, 2  ;;  %v1146_v57 = vpack.c.bf16 %v1055_v55, %v1055_v55 }
 0x169   :  { %v799_v59 = vadd.f32 %v798_v58, %v797_v56  ;;  %v2441_v56 = vld [vmem:[%s3067_s6 + $0x200] sm:$0xff]   ;;  %v2474_v58 = vmov 0.0  }
 0x16b   :  { %v800_v61 = vrot.slane %v799_v59, 1 }
 0x16d   :  { %v801_v1 = vadd.f32 %v800_v61, %v799_v59  ;;  %v2442_v59 = vld [vmem:[%s3067_s6 + $0x208] sm:$0xff]   ;;  %v2445_v61 = vld [vmem:[%s3067_s6 + $0x220] sm:$0xff]   ;;  %s2476_s6 = smov [#allocation2]  }
 0x16e   :  { %s1948_s1 = sshll.u32 %s2476_s6, 4  ;;  %s1949_s1 = int_to_ptr.vmem [resolvable:$true] %s1948_s1 }
 0x16f   :  { %v804_v4 = vmul.f32 0.00390625, %v801_v1  ;;  %v877_v1 = vsub.s32 7, %v2818_v9  ;;  %p2454_p1 = scmp.lt.s32.totalorder %s1949_s1, %s1949_s1 }
 0x171   :  { %v1142_v6 = vpack.c.bf16 %v804_v4, %v804_v4  ;;  %v878_v4 = vrot.slane %v2828_v22, %v877_v1 }
 0x173   :  { %v1154_v10 = vunpack.c.l.b16 %v1142_v6  ;;  %v1137_v6 = vadd.f32 %v2900_v2, %v878_v4 }
 0x175   :  { %v1155_v11 = vsel %vm891_vm1, %v1154_v10, %v1153_v8  ;;  %v1150_v7 = vpack.c.bf16 %v1137_v6, %v1137_v6 }
 0x176   :  { %v1156_v14 = vpack.c.b16 %v1155_v11, %v1155_v11 }
 0x178   :  { %1774 = vmatmul.mubr.bf16.vlgmr.msra.gmra.mrb[16].mxu1 %v1156_v14 }
 0x179   :  { %2177 = vmatpush3.bf16.msra.mxu1 %v2400_v12  ;;  %1813 = vmatprep.mubr.bf16.mxu1 %v1145_v13 }
 0x17a   :  { %2178 = vmatprep.subr.bf16.mxu1 %v2401_v15 }
 0x17d   :  { %2179 = vmatpush3.bf16.msra.mxu1 %v2402_v62 }
 0x17e   :  { %2180 = vmatprep.subr.bf16.mxu1 %v2403_v17  ;;  %v2043_v17 = vld [vmem:[%s3068_s7] ss:$0 sm:$0xff]  ;;  %s2449_s7 = scalar_lea.vmem %s1949_s1, 32 }
 0x17f   :  { %p2450_p0 = scmp.ne.s32.totalorder %s1949_s1, %s2449_s7  ;;  %p2455_p2 = scmp.lt.s32.totalorder %s2449_s7, %s2449_s7 }
 0x181   :  { %2181 = vmatpush3.bf16.msra.mxu1 %v2404_v18  ;;  %p2456_p3 = por %p2455_p2, %p2454_p1 }
 0x182   :  { %2182 = vmatprep.subr.bf16.mxu1 %v2407_v19 }
 0x183   :  { %p2457_p4 = pnand %p2456_p3, %p2450_p0 }
 0x185   :  { %2183 = vmatpush3.bf16.msra.mxu1 %v2408_v20 }
 0x186   :  { %2184 = vmatprep.subr.bf16.mxu1 %v2409_v21 }
 0x189   :  { %2185 = vmatpush3.bf16.msra.mxu1 %v2410_v3 }
 0x18a   :  { %2186 = vmatprep.subr.bf16.mxu1 %v2411_v23 }
 0x18d   :  { %2187 = vmatpush3.bf16.msra.mxu1 %v2412_v24 }
 0x18e   :  { %2188 = vmatprep.subr.bf16.mxu1 %v2413_v27 }
 0x191   :  { %2189 = vmatpush3.bf16.msra.mxu1 %v2414_v28 }
 0x192   :  { %2190 = vmatprep.subr.bf16.mxu1 %v2417_v31 }
 0x195   :  { %2191 = vmatpush3.bf16.msra.mxu1 %v2418_v32 }
 0x196   :  { %2198 = vmatprep.subr.bf16.mxu1 %v2419_v35 }
 0x198   :  { %1814 = vmatmul.mubr.bf16.vlgmr.msra.gmra.mrb[20].mxu1 %v1144_v40 }
 0x199   :  { %2199 = vmatpush3.bf16.msra.mxu1 %v2420_v37  ;;  %1853 = vmatprep.mubr.bf16.mxu1 %v1147_v39 }
 0x19a   :  { %2200 = vmatprep.subr.bf16.mxu1 %v2421_v41 }
 0x19d   :  { %2201 = vmatpush3.bf16.msra.mxu1 %v2422_v42 }
 0x19e   :  { %2202 = vmatprep.subr.bf16.mxu1 %v2423_v38 }
 0x1a1   :  { %2203 = vmatpush3.bf16.msra.mxu1 %v2424_v43 }
 0x1a2   :  { %2204 = vmatprep.subr.bf16.mxu1 %v2427_v44 }
 0x1a5   :  { %2205 = vmatpush3.bf16.msra.mxu1 %v2428_v45 }
 0x1a6   :  { %2206 = vmatprep.subr.bf16.mxu1 %v2429_v46 }
 0x1a9   :  { %2207 = vmatpush3.bf16.msra.mxu1 %v2430_v47 }
 0x1aa   :  { %2208 = vmatprep.subr.bf16.mxu1 %v2431_v48 }
 0x1ad   :  { %2209 = vmatpush3.bf16.msra.mxu1 %v2432_v49 }
 0x1ae   :  { %2210 = vmatprep.subr.bf16.mxu1 %v2435_v16 }
 0x1b1   :  { %2211 = vmatpush3.bf16.msra.mxu1 %v2436_v51 }
 0x1b2   :  { %2212 = vmatprep.subr.bf16.mxu1 %v2439_v53 }
 0x1b5   :  { %2213 = vmatpush3.bf16.msra.mxu1 %v2440_v54 }
 0x1b6   :  { %2319 = vmatprep.subr.bf16.mxu1 %v2474_v58 }
 0x1b8   :  { %1854 = vmatmul.mubr.bf16.vlgmr.msra.gmra.mrb[24].mxu1 %v1146_v57 }
 0x1b9   :  { %2320 = vmatpush3.bf16.msra.mxu1 %v2441_v56  ;;  %2335 = vmatprep.mubr.msk.bf16.mxu1 %vm2475_vm2, %v2474_v58 }
 0x1ba   :  { %2321 = vmatprep.subr.bf16.mxu1 %v2474_v58 }
 0x1bd   :  { %2322 = vmatpush3.bf16.msra.mxu1 %v2442_v59 }
 0x1be   :  { %2323 = vmatprep.subr.bf16.mxu1 %v2474_v58 }
 0x1c1   :  { %2324 = vmatpush3.bf16.msra.mxu1 %v2443_v63 }
 0x1c2   :  { %2325 = vmatprep.subr.bf16.mxu1 %v2474_v58 }
 0x1c5   :  { %2326 = vmatpush3.bf16.msra.mxu1 %v2444_v60 }
 0x1c6   :  { %2327 = vmatprep.subr.bf16.mxu1 %v2474_v58 }
 0x1c9   :  { %2328 = vmatpush3.bf16.msra.mxu1 %v2445_v61 }
 0x1ca   :  { %2329 = vmatprep.subr.bf16.mxu1 %v2474_v58 }
 0x1cd   :  { %2330 = vmatpush3.bf16.msra.mxu1 %v2446_v0 }
 0x1ce   :  { %2331 = vmatprep.subr.bf16.mxu1 %v2474_v58 }
 0x1d1   :  { %2332 = vmatpush3.bf16.msra.mxu1 %v2447_v36 }
 0x1d2   :  { %2333 = vmatprep.subr.bf16.mxu1 %v2474_v58 }
 0x1d5   :  { %2334 = vmatpush3.bf16.msra.mxu1 %v2448_v5 }
 0x1d8   :  { %2336 = vmatmul.mubr.bf16.vlgmr.msra.gmra.mrb[28].mxu1 %v1150_v7 }
 0x1f6   :  { %v2236_v9 = vpop.f32.mrb[64].mxu0 }
 0x1f7   :  { %v2237_v8 = vpop.f32.mrb[65].mxu0 }
 0x1f8   :  { %v2238_v10 = vadd.f32 %v2237_v8, %v2236_v9  ;;  %v2239_v11 = vpop.f32.mrb[66].mxu0 }
 0x1f9   :  { %v2240_v12 = vpop.f32.mrb[67].mxu0 }
 0x24b   :  { %v2170_v13 = vpop.f32.mrb[16].mxu1 }
 0x24c   :  { %v2171_v14 = vpop.f32.mrb[17].mxu1 }
 0x24d   :  { %v2172_v22 = vadd.f32 %v2171_v14, %v2170_v13  ;;  %v2173_v15 = vpop.f32.mrb[18].mxu1 }
 0x24e   :  { %v2174_v62 = vpop.f32.mrb[19].mxu1 }
 0x24f   :  { %v1776_v19 = vadd.f32 %v2172_v22, %v2043_v17 }
 0x26b   :  { %v2192_v18 = vpop.f32.mrb[20].mxu1 }
 0x26c   :  { %v2193_v2 = vpop.f32.mrb[21].mxu1 }
 0x26d   :  { %v2194_v20 = vadd.f32 %v2193_v2, %v2192_v18  ;;  %v2195_v21 = vpop.f32.mrb[22].mxu1 }
 0x26e   :  { %v2196_v3 = vpop.f32.mrb[23].mxu1 }
 0x26f   :  { %v1816_v23 = vadd.f32 %v2194_v20, %v1776_v19 }
 0x28b   :  { %v2214_v24 = vpop.f32.mrb[24].mxu1 }
 0x28c   :  { %v2215_v25 = vpop.f32.mrb[25].mxu1 }
 0x28d   :  { %v2216_v26 = vadd.f32 %v2215_v25, %v2214_v24  ;;  %v2217_v27 = vpop.f32.mrb[26].mxu1 }
 0x28e   :  { %v2218_v28 = vpop.f32.mrb[27].mxu1 }
 0x28f   :  { %v1856_v29 = vadd.f32 %v2216_v26, %v1816_v23 }
 0x291   :  { %v1896_v30 = vadd.f32 %v2238_v10, %v1856_v29 }
 0x2ab   :  { %v1935_v31 = vpop.f32.mrb[28].mxu1 }
 0x2ac   :  { %v1936_v32 = vadd.f32 %v1935_v31, %v1896_v30  ;;  %v2337_v33 = vpop.f32.mrb[29].mxu1 }
 0x2ad   :  { %v1938_v34 = vpop.f32.mrb[30].mxu1 }
 0x2ae   :  { %1941 = vst [vmem:[#allocation2] sm:$0x3] %v1936_v32  ;;  %v2338_v35 = vpop.f32.mrb[31].mxu1 }
 0x2af   :  { %2460 = shalt.err (!%p2457_p4)
}
 0x2b0   :  { %s2461_s21 = scalar_lea.hbm %s3069_s8, 32 }
 0x2b1   :  { %p2462_p5 = scmp.ne.s32.totalorder %s3069_s8, %s2461_s21  ;;  %p2465_p6 = scmp.lt.u32.totalorder %s2461_s21, %s3069_s8 }
 0x2b3   :  { %p2467_p7 = pnand %p2465_p6, %p2462_p5 }
 0x2b5   :  { %2470 = shalt.err (!%p2467_p7)
}
 0x2b6   :  { %1951 = dma.vmem_to_hbm [thread:$0]  %s1949_s1, 32, %s3069_s8, [#allocation3]  }
 0x2b7   :  { %2471 = dma.done.wait [#allocation3], 32  }
 0x2b8   :  { %2472 = vsyncadd [#allocation3], 4294967264 }
 0x2b9   :  { %1955 = vsyncpa [#allocation3], 1 }

</bundles_post_ra>
